<compile_context>
chip_gen: v7x
topology: tpu7x:2x2x1
jax: 0.10.0
libtpu: 0.0.40
codegen_flags: <defaults>
</compile_context>

<pallas_src>
import math

import jax
import jax.numpy as jnp
from jax import lax
from jax.experimental import pallas as pl
from jax.experimental.pallas import tpu as pltpu


# ----------------------------------------------------------------------------
# Parameter preparation (done ONCE, outside any step loop).
# ----------------------------------------------------------------------------
def prepare_ltc_params(weight_ih, bias_ih, weight_hh, bias_hh, tau):
    """weight_ih: [H, I], weight_hh: [H, H], biases/tau: [H].

    Returns (w_stacked [I+H, H], bias [1, H], inv_tau [1, H]).
    """
    H, I = weight_ih.shape
    assert weight_hh.shape == (H, H)
    w_stacked = jnp.concatenate([weight_ih.T, weight_hh.T], axis=0)  # [I+H, H]
    bias = (bias_ih + bias_hh).reshape(1, H)
    inv_tau = (1.0 / tau).reshape(1, H)
    return w_stacked, bias, inv_tau


# ----------------------------------------------------------------------------
# Single-step kernel: one fused MXU matmul + VPU elementwise tail.
# ----------------------------------------------------------------------------
def ltc_step_kernel(xh_ref, h_ref, w_ref, bias_ref, inv_tau_ref, out_ref):
    # pre = [x|h] @ [W_ih.T ; W_hh.T] + (bias_ih + bias_hh)
    pre = (
        jnp.dot(xh_ref[...], w_ref[...], preferred_element_type=jnp.float32)
        + bias_ref[...]                       # [1, H] broadcasts over batch
    )
    h = h_ref[...].astype(jnp.float32)
    # new_h = h + (pre - h) * (1/tau)   (divide hoisted to host)
    out_ref[...] = (h + (pre - h) * inv_tau_ref[...]).astype(out_ref.dtype)


def ltc_cell(x, h, w_stacked, bias, inv_tau):
    """One LTCCell step. x: [B, I], h: [B, H], w_stacked: [I+H, H]."""
    B, I = x.shape
    H = h.shape[1]
    assert w_stacked.shape == (I + H, H)

    xh = jnp.concatenate([x, h], axis=1)      # [B, I+H]

    vmem = pltpu.MemorySpace.VMEM
    return pl.pallas_call(
        ltc_step_kernel,
        out_shape=jax.ShapeDtypeStruct((B, H), x.dtype),
        in_specs=[
            pl.BlockSpec(memory_space=vmem),  # [x|h]
            pl.BlockSpec(memory_space=vmem),  # h
            pl.BlockSpec(memory_space=vmem),  # stacked weights
            pl.BlockSpec(memory_space=vmem),  # folded bias
            pl.BlockSpec(memory_space=vmem),  # inv_tau
        ],
        out_specs=pl.BlockSpec(memory_space=vmem),
        # new_hidden reuses the hidden-state buffer (in-place state update).
        input_output_aliases={1: 0},
    )(xh, h, w_stacked, bias, inv_tau)


# ----------------------------------------------------------------------------
# Fused recurrence kernel: whole time loop inside one pallas_call.
# Weights/bias/inv_tau stay VMEM-resident; hidden state lives in VMEM scratch.
# ----------------------------------------------------------------------------
def ltc_seq_kernel(x_ref, h0_ref, wih_ref, whh_ref, bias_ref, inv_tau_ref,
                   out_ref, h_scratch):
    @pl.when(pl.program_id(0) == 0)
    def _():
        h_scratch[...] = h0_ref[...].astype(jnp.float32)

    h = h_scratch[...]                                        # [B, H]
    # Contract on the weights' input axis: equivalent to x @ W.T with no
    # transpose materialized.
    dn = (((1,), (1,)), ((), ()))
    pre = (
        lax.dot_general(x_ref[...], wih_ref[...], dn,
                        preferred_element_type=jnp.float32)
        + lax.dot_general(h, whh_ref[...], dn,
                          preferred_element_type=jnp.float32)
        + bias_ref[...]
    )
    new_h = h + (pre - h) * inv_tau_ref[...]
    h_scratch[...] = new_h
    out_ref[...] = new_h.astype(out_ref.dtype)


def ltc_cell_sequence(xs, h0, weight_ih, weight_hh, bias, inv_tau):
    """Run the cell over a sequence. xs: [T, B, I], h0: [B, H] -> [T, B, H]."""
    T, B, I = xs.shape
    H = h0.shape[1]

    grid_spec = pltpu.PrefetchScalarGridSpec(
        num_scalar_prefetch=0,
        grid=(T,),
        in_specs=[
            pl.BlockSpec((None, B, I), lambda t: (t, 0, 0)),   # x_t (per step)
            pl.BlockSpec((B, H), lambda t: (0, 0)),            # h0   (resident)
            pl.BlockSpec((H, I), lambda t: (0, 0)),            # W_ih (resident)
            pl.BlockSpec((H, H), lambda t: (0, 0)),            # W_hh (resident)
            pl.BlockSpec((1, H), lambda t: (0, 0)),            # bias (resident)
            pl.BlockSpec((1, H), lambda t: (0, 0)),            # inv_tau
        ],
        out_specs=pl.BlockSpec((None, B, H), lambda t: (t, 0, 0)),
        scratch_shapes=[pltpu.VMEM((B, H), jnp.float32)],      # hidden state
    )
    return pl.pallas_call(
        ltc_seq_kernel,
        out_shape=jax.ShapeDtypeStruct((T, B, H), xs.dtype),
        grid_spec=grid_spec,
        compiler_params=pltpu.CompilerParams(
            dimension_semantics=("arbitrary",)),   # recurrence is sequential
    )(xs, h0, weight_ih, weight_hh, bias, inv_tau)


# ----------------------------------------------------------------------------
# Reference + init helpers
# ----------------------------------------------------------------------------
def _kaiming_uniform(key, shape):
    # nn.init.kaiming_uniform_ defaults: a=0, fan_in = shape[1],
    # gain = sqrt(2), bound = gain * sqrt(3 / fan_in)
    fan_in = shape[1]
    bound = math.sqrt(2.0) * math.sqrt(3.0 / fan_in)
    return jax.random.uniform(key, shape, jnp.float32, -bound, bound)


def _reference(x, h, weight_ih, bias_ih, weight_hh, bias_hh, tau):
    pre = (bias_ih + x @ weight_ih.T) + (bias_hh + h @ weight_hh.T)
    dh = (pre - h) / tau
    return h + dh


if __name__ == "__main__":
    B, I, H, T = 8, 16, 32, 8

    key = jax.random.PRNGKey(0)
    k_x, k_h, k_wih, k_whh, k_xs = jax.random.split(key, 5)

    x = jax.random.normal(k_x, (B, I), jnp.float32)
    h = jax.random.normal(k_h, (B, H), jnp.float32)
    xs = jax.random.normal(k_xs, (T, B, I), jnp.float32)

    weight_ih = _kaiming_uniform(k_wih, (H, I))
    weight_hh = _kaiming_uniform(k_whh, (H, H))
    bias_ih = jnp.zeros((H,), jnp.float32)
    bias_hh = jnp.zeros((H,), jnp.float32)
    tau = jnp.ones((H,), jnp.float32)

    # Prepare fused parameters ONCE (outside any step loop).
    w_stacked, bias, inv_tau = prepare_ltc_params(
        weight_ih, bias_ih, weight_hh, bias_hh, tau)

    # --- single-step kernel (matches nn.Module.forward exactly) -------------
    out = ltc_cell(x, h, w_stacked, bias, inv_tau)
    out = jax.block_until_ready(out)
    ref = _reference(x, h, weight_ih, bias_ih, weight_hh, bias_hh, tau)
    assert out.shape == (B, H)
    assert jnp.allclose(out, ref, atol=1e-5, rtol=1e-5), "step mismatch vs reference"

    # --- fused-sequence kernel (recurrence inside one pallas_call) ----------
    hs = ltc_cell_sequence(xs, h, weight_ih, weight_hh, bias, inv_tau)
    hs = jax.block_until_ready(hs)

    h_ref = h
    refs = []
    for t in range(T):
        h_ref = _reference(xs[t], h_ref, weight_ih, bias_ih,
                           weight_hh, bias_hh, tau)
        refs.append(h_ref)
    refs = jnp.stack(refs, axis=0)
    assert hs.shape == (T, B, H)
    assert jnp.allclose(hs, refs, atol=1e-4, rtol=1e-4), "sequence mismatch vs reference"

    print("KERNEL_OK")
</pallas_src>

<mosaic_0001>
module attributes {stable_mosaic.version = 11 : i64} {
  func.func @ltc_step_kernel(%arg0: memref<8x48xf32, #tpu.memory_space<vmem>>, %arg1: memref<8x32xf32, #tpu.memory_space<vmem>>, %arg2: memref<48x32xf32, #tpu.memory_space<vmem>>, %arg3: memref<1x32xf32, #tpu.memory_space<vmem>>, %arg4: memref<1x32xf32, #tpu.memory_space<vmem>>, %arg5: memref<8x32xf32, #tpu.memory_space<vmem>>) attributes {dimension_semantics = [], scalar_prefetch = 0 : i64, scratch_operands = 0 : i64, tpu.core_type = #tpu.core_type<tc>} {
    %c0 = arith.constant 0 : index
    %c0_0 = arith.constant 0 : index
    %0 = vector.load %arg0[%c0, %c0_0] : memref<8x48xf32, #tpu.memory_space<vmem>>, vector<8x48xf32>
    %c0_1 = arith.constant 0 : index
    %c0_2 = arith.constant 0 : index
    %1 = vector.load %arg2[%c0_1, %c0_2] : memref<48x32xf32, #tpu.memory_space<vmem>>, vector<48x32xf32>
    %cst = arith.constant dense<0.000000e+00> : vector<8x32xf32>
    %2 = tpu.matmul %0, %1, %cst {dimension_numbers = #tpu.dot_dimension_numbers<[1], [0], [0], [1], [0, 0, 1, 1], [], []>} : vector<8x48xf32>, vector<48x32xf32>, vector<8x32xf32> -> vector<8x32xf32>
    %c0_3 = arith.constant 0 : index
    %c0_4 = arith.constant 0 : index
    %3 = vector.load %arg3[%c0_3, %c0_4] : memref<1x32xf32, #tpu.memory_space<vmem>>, vector<1x32xf32>
    %4 = vector.broadcast %3 : vector<1x32xf32> to vector<8x32xf32>
    %5 = arith.addf %2, %4 : vector<8x32xf32>
    %c0_5 = arith.constant 0 : index
    %c0_6 = arith.constant 0 : index
    %6 = vector.load %arg1[%c0_5, %c0_6] : memref<8x32xf32, #tpu.memory_space<vmem>>, vector<8x32xf32>
    %7 = arith.subf %5, %6 : vector<8x32xf32>
    %c0_7 = arith.constant 0 : index
    %c0_8 = arith.constant 0 : index
    %8 = vector.load %arg4[%c0_7, %c0_8] : memref<1x32xf32, #tpu.memory_space<vmem>>, vector<1x32xf32>
    %9 = vector.broadcast %8 : vector<1x32xf32> to vector<8x32xf32>
    %10 = arith.mulf %7, %9 : vector<8x32xf32>
    %11 = arith.addf %6, %10 : vector<8x32xf32>
    %c0_9 = arith.constant 0 : index
    %c0_10 = arith.constant 0 : index
    %12 = vector.load %arg5[%c0_9, %c0_10] : memref<8x32xf32, #tpu.memory_space<vmem>>, vector<8x32xf32>
    tpu.vector_store %arg5[%c0_9, %c0_10], %11 {strides = array<i32>} : memref<8x32xf32, #tpu.memory_space<vmem>>, vector<8x32xf32>,
    return
  }
}

</mosaic_0001>

<bundles_post_ra>
// kernel: tpu_custom_call.1
= control target key start
LH: loop header
LB: loop body
LE: loop exit
PB: predicated region body
PF: predicated region fallthrough
CT: control target
= control target key end

     0   :  { %10 = vsyncpa [#allocation3], 0  ;;  %s322_s0 = inlined_call_operand.vmem [shape: f32[8,48], index: 0, kind: input, shape index: {}]   ;;  %s323_s1 = inlined_call_operand.hbm [shape: f32[8,32], index: 1, kind: input, shape index: {}, may-alias: {1,5}]   ;;  %s324_s2 = inlined_call_operand.vmem [shape: f32[48,32], index: 2, kind: input, shape index: {}]   ;;  %s325_s3 = inlined_call_operand.vmem [shape: f32[1,32], index: 3, kind: input, shape index: {}]   ;;  %s326_s4 = inlined_call_operand.vmem [shape: f32[1,32], index: 4, kind: input, shape index: {}]   ;;  %s327_s5 = inlined_call_operand.hbm [shape: f32[8,32], index: 5, kind: output, shape index: {}, may-alias: {1,5}]  }
   0x1   :  { %11 = vsyncpa [#allocation4], 0  ;;  %s236_s18 = smov [#allocation2]   ;;  %s188_s22 = scalar_lea.hbm %s323_s1, 128 }
   0x2   :  { %s20_s19 = sshll.u32 %s236_s18, 4  ;;  %p189_p0 = scmp.ne.s32.totalorder %s323_s1, %s188_s22  ;;  %s21_s19 = int_to_ptr.vmem [resolvable:$true] %s20_s19 }
   0x3   :  { %p192_p1 = scmp.lt.u32.totalorder %s188_s22, %s323_s1 }
   0x5   :  { %p194_p2 = pnand %p192_p1, %p189_p0 }
   0x7   :  { %197 = shalt.err (!%p194_p2)
}
   0x8   :  { %s198_s27 = scalar_lea.vmem %s21_s19, 128  ;;  %p203_p4 = scmp.lt.s32.totalorder %s21_s19, %s21_s19 }
   0x9   :  { %p199_p3 = scmp.ne.s32.totalorder %s21_s19, %s198_s27  ;;  %p204_p5 = scmp.lt.s32.totalorder %s198_s27, %s198_s27 }
   0xb   :  { %p205_p6 = por %p204_p5, %p203_p4 }
   0xd   :  { %p206_p7 = pnand %p205_p6, %p199_p3 }
   0xf   :  { %209 = shalt.err (!%p206_p7)
}
  0x10   :  { %23 = dma.hbm_to_vmem [thread:$0]  %s323_s1, 128, %s21_s19, [#allocation3]  }
  0x11   :  { %232 = dma.done.wait [#allocation3], 128  }
  0x12   :  { %233 = vsyncadd [#allocation3], 4294967168  ;;  %v237_v0 = vmov 0.0|0.0   ;;  %vm238_vm0 = vmmov 0   ;;  %v239_v1 = vmov 0.0   ;;  %v34_v2 = vld [vmem:[%s324_s2] sm:$0xff] }
  0x13   :  { %174 = vmatprep.subr.bf16.mxu0 %v237_v0  ;;  %171 = vmatprep.mubr.msk.f32.mxu0 %vm238_vm0, %v239_v1  ;;  %v35_v3 = vld [vmem:[%s324_s2 + $0x8] sm:$0xff]  ;;  %v36_v4 = vld [vmem:[%s324_s2 + $0x10] sm:$0xff]  ;;  %v37_v6 = vld [vmem:[%s324_s2 + $0x18] sm:$0xff]  ;;  %vm47_vm1 = vcmask 392192   ;;  %s240_s21 = smov [#allocation5]   ;;  %vm132_vm2 = vcmask 261120  }
  0x14   :  { %v175_v5 = vpack.c.bf16 %v35_v3, %v34_v2  ;;  %v178_v7 = vpack.c.bf16 %v37_v6, %v36_v4  ;;  %v38_v8 = vld [vmem:[%s324_s2 + $0x20] sm:$0xff]  ;;  %v39_v9 = vld [vmem:[%s324_s2 + $0x28] sm:$0xff]  ;;  %s140_s22 = sshll.u32 %s240_s21, 4  ;;  %s141_s22 = int_to_ptr.vmem [resolvable:$true] %s140_s22 }
  0x15   :  { %v181_v10 = vpack.c.bf16 %v39_v9, %v38_v8  ;;  %v33_v11 = vld [vmem:[%s322_s0] sm:$0xff]  ;;  %s210_s0 = scalar_lea.vmem %s141_s22, 128  ;;  %p215_p9 = scmp.lt.s32.totalorder %s141_s22, %s141_s22 }
  0x16   :  { %176 = vmatpush3.bf16.msra.mxu0 %v175_v5  ;;  %v149_v12 = vld [vmem:[%s325_s3] ss:$0 sm:$0xff]  ;;  %p211_p8 = scmp.ne.s32.totalorder %s141_s22, %s210_s0  ;;  %p216_p10 = scmp.lt.s32.totalorder %s210_s0, %s210_s0 }
  0x17   :  { %177 = vmatprep.subr.bf16.mxu0 %v237_v0  ;;  %v121_v14 = vld [vmem:[#allocation2] sm:$0xff] }
  0x18   :  { %v151_v17 = vld [vmem:[%s326_s4] ss:$0 sm:$0xff]  ;;  %p217_p11 = por %p216_p10, %p215_p9 }
  0x1a   :  { %179 = vmatpush3.bf16.msra.mxu0 %v178_v7  ;;  %p218_p12 = pnand %p217_p11, %p211_p8 }
  0x1b   :  { %180 = vmatprep.subr.bf16.mxu0 %v237_v0 }
  0x1e   :  { %182 = vmatpush3.bf16.msra.mxu0 %v181_v10 }
  0x21   :  { %172 = vmatmul.mubr.msk.f32.vlgmr.msra.gmra.mrb[0].mxu0 %vm47_vm1, %v33_v11 }
  0xf4   :  { %v117_v13 = vpop.f32.mrb[0].mxu0 }
  0xf5   :  { %v118_v15 = vadd.f32 %v149_v12, %v117_v13  ;;  %v173_v16 = vpop.f32.mrb[1].mxu0 }
  0xf7   :  { %v122_v18 = vsub.f32 %v118_v15, %v121_v14 }
  0xf9   :  { %v130_v19 = vmul.f32 %v151_v17, %v122_v18 }
  0xfb   :  { %v131_v20 = vadd.f32 %v130_v19, %v121_v14 }
  0xfd   :  { %133 = vst.msk [vmem:[#allocation5] sm:$0xff] %vm132_vm2, %v131_v20 }
  0xfe   :  { %221 = shalt.err (!%p218_p12)
}
  0xff   :  { %s222_s24 = scalar_lea.hbm %s327_s5, 128 }
 0x100   :  { %p223_p13 = scmp.ne.s32.totalorder %s327_s5, %s222_s24  ;;  %p226_p0 = scmp.lt.u32.totalorder %s222_s24, %s327_s5 }
 0x102   :  { %p228_p1 = pnand %p226_p0, %p223_p13 }
 0x104   :  { %231 = shalt.err (!%p228_p1)
}
 0x105   :  { %143 = dma.vmem_to_hbm [thread:$0]  %s141_s22, 128, %s327_s5, [#allocation4]  }
 0x106   :  { %234 = dma.done.wait [#allocation4], 128  }
 0x107   :  { %235 = vsyncadd [#allocation4], 4294967168 }
 0x108   :  { %147 = vsyncpa [#allocation3], 1 }
 0x109   :  { %148 = vsyncpa [#allocation4], 1 }

</bundles_post_ra>
